<compile_context>
chip_gen: v5e
topology: v5e:2x2
jax: 0.10.0
libtpu: 0.0.40
codegen_flags: <defaults>
</compile_context>

<pallas_src>
import functools

import jax
import jax.numpy as jnp
from jax.experimental import pallas as pl
from jax.experimental.pallas import tpu as pltpu

LANE = 128


def _round_up(n, m):
    return ((n + m - 1) // m) * m


def decoder_kernel(x_ref, w1_ref, b1_ref, w2_ref, b2_ref, w3_ref, b3_ref, o_ref, *, out_dim):
    # ---- Layer 1: tiny K (embedding_dim=2) -> VPU broadcast FMAs, no MXU push ----
    x = x_ref[...]                                        # (TB, E) f32
    w1 = w1_ref[...]                                      # (E, H2) f32
    h1 = jnp.broadcast_to(b1_ref[...], (x.shape[0], w1.shape[1]))
    for e in range(w1.shape[0]):                          # E is tiny & static
        h1 = h1 + x[:, e:e + 1] * w1[e:e + 1, :]
    h1 = jnp.maximum(h1, 0.0)                             # ReLU

    # ---- Layer 2: (TB,16) @ (16,128) on the MXU, f32 accumulation ----
    h2 = jnp.dot(h1.astype(w2_ref.dtype), w2_ref[...],
                 preferred_element_type=jnp.float32)
    h2 = jnp.maximum(h2 + b2_ref[...], 0.0)               # ReLU (f32)

    # ---- Layer 3: (TB,128) @ (128, OUT_PAD) lane-dense on the MXU ----
    logits = jnp.dot(h2.astype(w3_ref.dtype), w3_ref[...],
                     preferred_element_type=jnp.float32)
    # Drop the zero-weight lane padding BEFORE bias/EUP/store: no wasted tanh pushes, and the
    # store goes straight to the (TB, 784) output block (784 == full last dim, so it is legal;
    # only the last vreg column is a masked vst).
    logits = logits[:, :out_dim] + b3_ref[...]

    # sigmoid(x) == 0.5 * tanh(0.5 * x) + 0.5  (one EUP transcendental per vreg)
    o_ref[...] = (0.5 * jnp.tanh(0.5 * logits) + 0.5).astype(o_ref.dtype)


def prepare_params(params, *, mxu_dtype=jnp.float32):
    """One-time layout prep: transpose PyTorch (out,in) -> (in,out); lane-pad only the MXU
    operand of layer 3 (the kernel's output is NOT padded).  mxu_dtype=jnp.bfloat16 feeds the
    MXU in bf16 (recommended on v7x); biases / elementwise math stay f32."""
    w1 = jnp.asarray(params["w1"], jnp.float32).T                 # (E,  H2) f32 (VPU layer)
    w2 = jnp.asarray(params["w2"], jnp.float32).T.astype(mxu_dtype)  # (H2, H1)
    w3 = jnp.asarray(params["w3"], jnp.float32).T                 # (H1, OUT)
    b1 = jnp.asarray(params["b1"], jnp.float32).reshape(1, -1)
    b2 = jnp.asarray(params["b2"], jnp.float32).reshape(1, -1)
    b3 = jnp.asarray(params["b3"], jnp.float32).reshape(1, -1)    # (1, OUT) - NOT padded
    out_dim = w3.shape[1]
    out_pad = _round_up(out_dim, LANE)                            # 784 -> 896 (MXU operand only)
    if out_pad != out_dim:
        w3 = jnp.pad(w3, ((0, 0), (0, out_pad - out_dim)))
    w3 = w3.astype(mxu_dtype)
    return {"w1": w1, "b1": b1, "w2": w2, "b2": b2, "w3": w3, "b3": b3,
            "out_dim": out_dim}


def _choose_batch_tile(B, tile_b):
    """Pick the batch tile: big (amortizes ~0.35us/step overhead), >=4 grid steps when the batch
    allows it (v7x megacore), and preferably dividing the sublane-rounded batch so the wrapper's
    out[:B] padding slice (a full extra HBM copy) disappears."""
    b8 = _round_up(B, 8)
    tb = min(_round_up(tile_b, 8), b8)
    if b8 >= 32:                                   # keep >=4 steps so both v7x TCs get work
        tb = min(tb, _round_up(-(-b8 // 4), 8))
    # Prefer an evenly-dividing tile, but never shrink more than ~2x for it.
    for cand in range(tb, max(tb // 2, 8) - 1, -8):
        if b8 % cand == 0:
            return cand
    return tb


def decoder_forward(x, prepared, *, tile_b=1024, out_dtype=jnp.float32):
    """x: (B, embedding_dim) float32. prepared: output of prepare_params()."""
    w1, b1 = prepared["w1"], prepared["b1"]
    w2, b2 = prepared["w2"], prepared["b2"]
    w3, b3 = prepared["w3"], prepared["b3"]
    out_dim = prepared["out_dim"]

    B, E = x.shape
    H2 = w1.shape[1]
    H1 = w2.shape[1]
    OUT_PAD = w3.shape[1]

    tb = _choose_batch_tile(B, tile_b)
    Bp = _round_up(B, tb)
    if Bp != B:
        x = jnp.pad(x, ((0, Bp - B), (0, 0)))

    grid = (Bp // tb,)
    out = pl.pallas_call(
        functools.partial(decoder_kernel, out_dim=out_dim),
        out_shape=jax.ShapeDtypeStruct((Bp, out_dim), out_dtype),
        grid_spec=pltpu.PrefetchScalarGridSpec(
            num_scalar_prefetch=0,
            grid=grid,
            in_specs=[
                pl.BlockSpec((tb, E), lambda i: (i, 0)),        # x tile
                pl.BlockSpec((E, H2), lambda i: (0, 0)),        # w1 (resident)
                pl.BlockSpec((1, H2), lambda i: (0, 0)),        # b1
                pl.BlockSpec((H2, H1), lambda i: (0, 0)),       # w2
                pl.BlockSpec((1, H1), lambda i: (0, 0)),        # b2
                pl.BlockSpec((H1, OUT_PAD), lambda i: (0, 0)),  # w3 (lane-padded MXU operand)
                pl.BlockSpec((1, out_dim), lambda i: (0, 0)),   # b3 (unpadded)
            ],
            # Output is the real 784-wide row: no padded writes, no wrapper lane-slice copy.
            out_specs=pl.BlockSpec((tb, out_dim), lambda i: (i, 0)),
        ),
        compiler_params=pltpu.CompilerParams(
            dimension_semantics=("parallel",),   # batch tiles shard across TCs (v7x megacore)
        ),
    )(x, w1, b1, w2, b2, w3, b3)

    if Bp != B:                                  # only when an evenly-dividing tile was impossible
        out = out[:B]
    return out


def init_params(key, output_dim=28 * 28, hidden_dim1=128, hidden_dim2=16,
                embedding_dim=2):
    """Deterministic synthetic init; shapes match the PyTorch module exactly."""
    ks = jax.random.split(key, 6)

    def lin(kw, kb, fan_in, fan_out):
        bound = 1.0 / jnp.sqrt(fan_in)
        w = jax.random.uniform(kw, (fan_out, fan_in), jnp.float32, -bound, bound)
        b = jax.random.uniform(kb, (fan_out,), jnp.float32, -bound, bound)
        return w, b

    w1, b1 = lin(ks[0], ks[1], embedding_dim, hidden_dim2)
    w2, b2 = lin(ks[2], ks[3], hidden_dim2, hidden_dim1)
    w3, b3 = lin(ks[4], ks[5], hidden_dim1, output_dim)
    return {"w1": w1, "b1": b1, "w2": w2, "b2": b2, "w3": w3, "b3": b3}


def decoder_ref(x, p):
    h1 = jax.nn.relu(x @ p["w1"].T + p["b1"])
    h2 = jax.nn.relu(h1 @ p["w2"].T + p["b2"])
    return jax.nn.sigmoid(h2 @ p["w3"].T + p["b3"])


if __name__ == "__main__":
    key = jax.random.PRNGKey(0)
    kx, kp = jax.random.split(key)

    B, EMB = 8, 2                                  # small batch, embedding_dim=2
    x = jax.random.normal(kx, (B, EMB), jnp.float32)
    params = init_params(kp)
    prepared = prepare_params(params)              # one-time weight layout prep (f32 path)

    # 1) f32 everywhere: tight correctness check, single grid step.
    out = jax.block_until_ready(decoder_forward(x, prepared))
    ref = decoder_ref(x, params)
    assert out.shape == (B, 28 * 28)
    assert jnp.allclose(out, ref, atol=1e-5, rtol=1e-5), "mismatch vs reference (small batch)"

    # 2) Multi-step grid, tile chosen to divide the batch (no padding, no wrapper slice).
    B2 = 200
    x2 = jax.random.normal(kx, (B2, EMB), jnp.float32)
    out2 = jax.block_until_ready(decoder_forward(x2, prepared, tile_b=64))
    ref2 = decoder_ref(x2, params)
    assert out2.shape == (B2, 28 * 28)
    assert jnp.allclose(out2, ref2, atol=1e-5, rtol=1e-5), "mismatch vs reference (tiled batch)"

    # 3) v7x-oriented path: bf16 MXU feeds + bf16 output stream (halves the HBM write);
    #    correctness checked against the f32 reference with a bf16-appropriate tolerance.
    prepared_bf16 = prepare_params(params, mxu_dtype=jnp.bfloat16)
    out3 = jax.block_until_ready(
        decoder_forward(x2, prepared_bf16, tile_b=64, out_dtype=jnp.bfloat16))
    assert out3.dtype == jnp.bfloat16
    assert jnp.allclose(out3.astype(jnp.float32), ref2, atol=3e-2, rtol=0), \
        "mismatch vs reference (bf16 path)"

    print("KERNEL_OK")
</pallas_src>

<mosaic_0001>
module attributes {stable_mosaic.version = 11 : i64} {
  func.func @decoder_kernel(%arg0: i32, %arg1: memref<8x2xf32, #tpu.memory_space<vmem>>, %arg2: memref<2x16xf32, #tpu.memory_space<vmem>>, %arg3: memref<1x16xf32, #tpu.memory_space<vmem>>, %arg4: memref<16x128xf32, #tpu.memory_space<vmem>>, %arg5: memref<1x128xf32, #tpu.memory_space<vmem>>, %arg6: memref<128x896xf32, #tpu.memory_space<vmem>>, %arg7: memref<1x784xf32, #tpu.memory_space<vmem>>, %arg8: memref<8x784xf32, #tpu.memory_space<vmem>>) attributes {dimension_semantics = [#tpu.dimension_semantics<parallel>], iteration_bounds = array<i64: 1>, scalar_prefetch = 0 : i64, scratch_operands = 0 : i64, tpu.core_type = #tpu.core_type<tc>, window_params = [{transform_indices = @transform_0, window_bounds = array<i64: 8, 2>}, {pipeline_mode = #tpu.pipeline_mode<synchronous>, transform_indices = @transform_1, window_bounds = array<i64: 2, 16>}, {pipeline_mode = #tpu.pipeline_mode<synchronous>, transform_indices = @transform_2, window_bounds = array<i64: 1, 16>}, {pipeline_mode = #tpu.pipeline_mode<synchronous>, transform_indices = @transform_3, window_bounds = array<i64: 16, 128>}, {pipeline_mode = #tpu.pipeline_mode<synchronous>, transform_indices = @transform_4, window_bounds = array<i64: 1, 128>}, {pipeline_mode = #tpu.pipeline_mode<synchronous>, transform_indices = @transform_5, window_bounds = array<i64: 128, 896>}, {pipeline_mode = #tpu.pipeline_mode<synchronous>, transform_indices = @transform_6, window_bounds = array<i64: 1, 784>}, {transform_indices = @transform_7, window_bounds = array<i64: 8, 784>}]} {
    %c0 = arith.constant 0 : index
    %c0_0 = arith.constant 0 : index
    %0 = vector.load %arg1[%c0, %c0_0] : memref<8x2xf32, #tpu.memory_space<vmem>>, vector<8x2xf32>
    %c0_1 = arith.constant 0 : index
    %c0_2 = arith.constant 0 : index
    %1 = vector.load %arg2[%c0_1, %c0_2] : memref<2x16xf32, #tpu.memory_space<vmem>>, vector<2x16xf32>
    %c0_3 = arith.constant 0 : index
    %c0_4 = arith.constant 0 : index
    %2 = vector.load %arg3[%c0_3, %c0_4] : memref<1x16xf32, #tpu.memory_space<vmem>>, vector<1x16xf32>
    %3 = vector.shape_cast %2 : vector<1x16xf32> to vector<1x16xf32>
    %4 = vector.broadcast %3 : vector<1x16xf32> to vector<8x16xf32>
    %5 = vector.extract_strided_slice %0 {offsets = [0, 0], sizes = [8, 1], strides = [1, 1]} : vector<8x2xf32> to vector<8x1xf32>
    %6 = vector.extract_strided_slice %1 {offsets = [0, 0], sizes = [1, 16], strides = [1, 1]} : vector<2x16xf32> to vector<1x16xf32>
    %7 = vector.broadcast %5 : vector<8x1xf32> to vector<8x16xf32>
    %8 = vector.broadcast %6 : vector<1x16xf32> to vector<8x16xf32>
    %9 = arith.mulf %7, %8 : vector<8x16xf32>
    %10 = arith.addf %4, %9 : vector<8x16xf32>
    %11 = vector.extract_strided_slice %0 {offsets = [0, 1], sizes = [8, 1], strides = [1, 1]} : vector<8x2xf32> to vector<8x1xf32>
    %12 = vector.extract_strided_slice %1 {offsets = [1, 0], sizes = [1, 16], strides = [1, 1]} : vector<2x16xf32> to vector<1x16xf32>
    %13 = vector.broadcast %11 : vector<8x1xf32> to vector<8x16xf32>
    %14 = vector.broadcast %12 : vector<1x16xf32> to vector<8x16xf32>
    %15 = arith.mulf %13, %14 : vector<8x16xf32>
    %16 = arith.addf %10, %15 : vector<8x16xf32>
    %cst = arith.constant 0.000000e+00 : f32
    %17 = vector.broadcast %cst : f32 to vector<8x16xf32>
    %18 = arith.maximumf %16, %17 : vector<8x16xf32>
    %c0_5 = arith.constant 0 : index
    %c0_6 = arith.constant 0 : index
    %19 = vector.load %arg4[%c0_5, %c0_6] : memref<16x128xf32, #tpu.memory_space<vmem>>, vector<16x128xf32>
    %cst_7 = arith.constant dense<0.000000e+00> : vector<8x128xf32>
    %20 = tpu.matmul %18, %19, %cst_7 {dimension_numbers = #tpu.dot_dimension_numbers<[1], [0], [0], [1], [0, 0, 1, 1], [], []>} : vector<8x16xf32>, vector<16x128xf32>, vector<8x128xf32> -> vector<8x128xf32>
    %c0_8 = arith.constant 0 : index
    %c0_9 = arith.constant 0 : index
    %21 = vector.load %arg5[%c0_8, %c0_9] : memref<1x128xf32, #tpu.memory_space<vmem>>, vector<1x128xf32>
    %22 = vector.broadcast %21 : vector<1x128xf32> to vector<8x128xf32>
    %23 = arith.addf %20, %22 : vector<8x128xf32>
    %cst_10 = arith.constant 0.000000e+00 : f32
    %24 = vector.broadcast %cst_10 : f32 to vector<8x128xf32>
    %25 = arith.maximumf %23, %24 : vector<8x128xf32>
    %c0_11 = arith.constant 0 : index
    %c0_12 = arith.constant 0 : index
    %26 = vector.load %arg6[%c0_11, %c0_12] : memref<128x896xf32, #tpu.memory_space<vmem>>, vector<128x896xf32>
    %cst_13 = arith.constant dense<0.000000e+00> : vector<8x896xf32>
    %27 = tpu.matmul %25, %26, %cst_13 {dimension_numbers = #tpu.dot_dimension_numbers<[1], [0], [0], [1], [0, 0, 1, 1], [], []>} : vector<8x128xf32>, vector<128x896xf32>, vector<8x896xf32> -> vector<8x896xf32>
    %28 = vector.extract_strided_slice %27 {offsets = [0, 0], sizes = [8, 784], strides = [1, 1]} : vector<8x896xf32> to vector<8x784xf32>
    %c0_14 = arith.constant 0 : index
    %c0_15 = arith.constant 0 : index
    %29 = vector.load %arg7[%c0_14, %c0_15] : memref<1x784xf32, #tpu.memory_space<vmem>>, vector<1x784xf32>
    %30 = vector.broadcast %29 : vector<1x784xf32> to vector<8x784xf32>
    %31 = arith.addf %28, %30 : vector<8x784xf32>
    %cst_16 = arith.constant 5.000000e-01 : f32
    %32 = vector.broadcast %cst_16 : f32 to vector<8x784xf32>
    %33 = arith.mulf %32, %31 : vector<8x784xf32>
    %34 = math.tanh %33 : vector<8x784xf32>
    %cst_17 = arith.constant 5.000000e-01 : f32
    %35 = vector.broadcast %cst_17 : f32 to vector<8x784xf32>
    %36 = arith.mulf %35, %34 : vector<8x784xf32>
    %cst_18 = arith.constant 5.000000e-01 : f32
    %37 = vector.broadcast %cst_18 : f32 to vector<8x784xf32>
    %38 = arith.addf %36, %37 : vector<8x784xf32>
    %c0_19 = arith.constant 0 : index
    %c0_20 = arith.constant 0 : index
    %39 = vector.load %arg8[%c0_19, %c0_20] : memref<8x784xf32, #tpu.memory_space<vmem>>, vector<8x784xf32>
    tpu.vector_store %arg8[%c0_19, %c0_20], %38 {strides = array<i32>} : memref<8x784xf32, #tpu.memory_space<vmem>>, vector<8x784xf32>,
    return
  }
  func.func @transform_0(%arg0: i32) -> (i32, i32) {
    %c0_i32 = arith.constant 0 : i32
    %c0_i32_0 = arith.constant 0 : i32
    return %arg0, %c0_i32 : i32, i32
  }
  func.func @transform_1(%arg0: i32) -> (i32, i32) {
    %c0_i32 = arith.constant 0 : i32
    %c0_i32_0 = arith.constant 0 : i32
    %c0_i32_1 = arith.constant 0 : i32
    return %c0_i32, %c0_i32_0 : i32, i32
  }
  func.func @transform_2(%arg0: i32) -> (i32, i32) {
    %c0_i32 = arith.constant 0 : i32
    %c0_i32_0 = arith.constant 0 : i32
    %c0_i32_1 = arith.constant 0 : i32
    return %c0_i32, %c0_i32_0 : i32, i32
  }
  func.func @transform_3(%arg0: i32) -> (i32, i32) {
    %c0_i32 = arith.constant 0 : i32
    %c0_i32_0 = arith.constant 0 : i32
    %c0_i32_1 = arith.constant 0 : i32
    return %c0_i32, %c0_i32_0 : i32, i32
  }
  func.func @transform_4(%arg0: i32) -> (i32, i32) {
    %c0_i32 = arith.constant 0 : i32
    %c0_i32_0 = arith.constant 0 : i32
    %c0_i32_1 = arith.constant 0 : i32
    return %c0_i32, %c0_i32_0 : i32, i32
  }
  func.func @transform_5(%arg0: i32) -> (i32, i32) {
    %c0_i32 = arith.constant 0 : i32
    %c0_i32_0 = arith.constant 0 : i32
    %c0_i32_1 = arith.constant 0 : i32
    return %c0_i32, %c0_i32_0 : i32, i32
  }
  func.func @transform_6(%arg0: i32) -> (i32, i32) {
    %c0_i32 = arith.constant 0 : i32
    %c0_i32_0 = arith.constant 0 : i32
    %c0_i32_1 = arith.constant 0 : i32
    return %c0_i32, %c0_i32_0 : i32, i32
  }
  func.func @transform_7(%arg0: i32) -> (i32, i32) {
    %c0_i32 = arith.constant 0 : i32
    %c0_i32_0 = arith.constant 0 : i32
    return %arg0, %c0_i32 : i32, i32
  }
}

</mosaic_0001>

<bundles_post_ra>
// kernel: tpu_custom_call.1
= control target key start
LH: loop header
LB: loop body
LE: loop exit
PB: predicated region body
PF: predicated region fallthrough
CT: control target
= control target key end

     0   :  { %12 = vsyncpa [#allocation3], 0  ;;  %s621_s0 = inlined_call_operand.vmem [shape: f32[8,2], index: 0, kind: input, shape index: {}]   ;;  %s622_s1 = inlined_call_operand.vmem [shape: f32[2,16], index: 1, kind: input, shape index: {}]   ;;  %s623_s2 = inlined_call_operand.vmem [shape: f32[1,16], index: 2, kind: input, shape index: {}]   ;;  %s624_s3 = inlined_call_operand.hbm [shape: f32[16,128], index: 3, kind: input, shape index: {}]   ;;  %s625_s4 = inlined_call_operand.vmem [shape: f32[1,128], index: 4, kind: input, shape index: {}]   ;;  %s626_s5 = inlined_call_operand.hbm [shape: f32[128,896], index: 5, kind: input, shape index: {}]   ;;  %s627_s6 = inlined_call_operand.vmem [shape: f32[1,784], index: 6, kind: input, shape index: {}]   ;;  %s628_s7 = inlined_call_operand.hbm [shape: f32[8,784], index: 7, kind: output, shape index: {}]  }
   0x1   :  { %13 = vsyncpa [#allocation6], 0 }
   0x2   :  { %14 = vsyncpa [#allocation4], 0  ;;  %s25_s26 = sshll.u32 %s624_s3, 4  ;;  %s546_s27 = smov [#allocation2]   ;;  %s26_s26 = int_to_ptr.hbm [resolvable:$true] %s25_s26 }
   0x3   :  { %s27_s28 = sshll.u32 %s546_s27, 4  ;;  %s40_s8 = sshll.u32 %s626_s5, 4  ;;  %s28_s28 = int_to_ptr.vmem [resolvable:$true] %s27_s28  ;;  %s41_s8 = int_to_ptr.hbm [resolvable:$true] %s40_s8 }
   0x4   :  { %s547_s9 = smov 128   ;;  %s548_s10 = smov 8  }
   0x5   :  { %33 = dma.hbm_to_vmem [thread:$0]  %s26_s26, 256, %s28_s28, [#allocation3], %s547_s9, %s547_s9, %s548_s10  }
   0x6   :  { %s549_s11 = smov [#allocation5]   ;;  %s550_s13 = smov 896  }
   0x7   :  { %s42_s12 = sshll.u32 %s549_s11, 4  ;;  %s551_s14 = smov 56   ;;  %s43_s12 = int_to_ptr.vmem [resolvable:$true] %s42_s12 }
   0x8   :  { %48 = dma.hbm_to_vmem [thread:$0]  %s41_s8, 14336, %s43_s12, [#allocation6], %s550_s13, %s550_s13, %s551_s14  }
   0x9   :  { %540 = dma.done.wait [#allocation3], 256  }
   0xa   :  { %541 = vsyncadd [#allocation3], 4294967040 }
   0xb   :  { %542 = dma.done.wait [#allocation6], 14336  }
   0xc   :  { %543 = vsyncadd [#allocation6], 4294952960  ;;  %v552_v0 = vmov 0   ;;  %v59_v1 = vld [vmem:[%s621_s0] sm:$0xff]  ;;  %v553_v2 = vmov 1   ;;  %v82_v3 = vld [vmem:[#allocation2 + $0x8] sm:$0xff] }
   0xd   :  { %450 = vset.pattern.permute.xlu0 %v552_v0  ;;  %105 = vmatpush.msra.mxu0 %v82_v3  ;;  %v81_v4 = vld [vmem:[#allocation2] sm:$0xff]  ;;  %v217_v5 = vld [vmem:[#allocation5 + $0x348] sm:$0xff]  ;;  %v219_v7 = vld [vmem:[#allocation5 + $0x358] sm:$0xff]  ;;  %vm87_vm0 = vcmask 130048   ;;  %s429_s22 = sshll.u32 %s628_s7, 4  ;;  %s430_s22 = int_to_ptr.hbm [resolvable:$true] %s429_s22 }
   0xe   :  { %67 = vperm.xlu0 %450, %v59_v1   ;;  %v218_v6 = vld [vmem:[#allocation5 + $0x350] sm:$0xff]  ;;  %224 = vmatpush.msra.mxu1 %v217_v5  ;;  %v211_v9 = vld [vmem:[#allocation5 + $0x318] sm:$0xff]  ;;  %v212_v10 = vld [vmem:[#allocation5 + $0x320] sm:$0xff] }
   0xf   :  { %106 = vmatpush.msra.mxu0 %v81_v4  ;;  %244 = vmatpush.msra.mxu2 %v218_v6  ;;  %v210_v8 = vld [vmem:[#allocation5 + $0x310] sm:$0xff]  ;;  %v203_v11 = vld [vmem:[#allocation5 + $0x2d8] sm:$0xff]  ;;  %v204_v12 = vld [vmem:[#allocation5 + $0x2e0] sm:$0xff] }
  0x10   :  { %264 = vmatpush.msra.mxu3 %v219_v7  ;;  %225 = vmatpush.msra.mxu1 %v210_v8  ;;  %v205_v13 = vld [vmem:[#allocation5 + $0x2e8] sm:$0xff]  ;;  %v196_v14 = vld [vmem:[#allocation5 + $0x2a0] sm:$0xff]  ;;  %v198_v16 = vld [vmem:[#allocation5 + $0x2b0] sm:$0xff] }
  0x11   :  { %245 = vmatpush.msra.mxu2 %v211_v9  ;;  %v197_v15 = vld [vmem:[#allocation5 + $0x2a8] sm:$0xff]  ;;  %v190_v18 = vld [vmem:[#allocation5 + $0x270] sm:$0xff]  ;;  %v191_v19 = vld [vmem:[#allocation5 + $0x278] sm:$0xff] }
  0x12   :  { %265 = vmatpush.msra.mxu3 %v212_v10  ;;  %226 = vmatpush.msra.mxu1 %v203_v11  ;;  %v189_v17 = vld [vmem:[#allocation5 + $0x268] sm:$0xff]  ;;  %v182_v20 = vld [vmem:[#allocation5 + $0x230] sm:$0xff]  ;;  %v183_v21 = vld [vmem:[#allocation5 + $0x238] sm:$0xff] }
  0x13   :  { %246 = vmatpush.msra.mxu2 %v204_v12  ;;  %v184_v22 = vld [vmem:[#allocation5 + $0x240] sm:$0xff]  ;;  %v175_v23 = vld [vmem:[#allocation5 + $0x1f8] sm:$0xff]  ;;  %v177_v25 = vld [vmem:[#allocation5 + $0x208] sm:$0xff] }
  0x14   :  { %266 = vmatpush.msra.mxu3 %v205_v13  ;;  %227 = vmatpush.msra.mxu1 %v196_v14  ;;  %v176_v24 = vld [vmem:[#allocation5 + $0x200] sm:$0xff]  ;;  %v169_v27 = vld [vmem:[#allocation5 + $0x1c8] sm:$0xff]  ;;  %v170_v29 = vld [vmem:[#allocation5 + $0x1d0] sm:$0xff] }
  0x15   :  { %247 = vmatpush.msra.mxu2 %v197_v15  ;;  %v168_v26 = vld [vmem:[#allocation5 + $0x1c0] sm:$0xff]  ;;  %v213_v30 = vld [vmem:[#allocation5 + $0x328] sm:$0xff]  ;;  %v162_v32 = vld [vmem:[#allocation5 + $0x190] sm:$0xff] }
  0x16   :  { %451 = vset.pattern.permute.xlu0 %v553_v2  ;;  %267 = vmatpush.msra.mxu3 %v198_v16  ;;  %v220_v28 = vld [vmem:[#allocation5 + $0x360] sm:$0xff]  ;;  %v161_v31 = vld [vmem:[#allocation5 + $0x188] sm:$0xff]  ;;  %v60_v33 = vld [vmem:[%s622_s1] sm:$0x3] }
  0x17   :  { %74 = vperm.xlu0 %451, %v59_v1   ;;  %228 = vmatpush.msra.mxu1 %v189_v17  ;;  %v163_v34 = vld [vmem:[#allocation5 + $0x198] sm:$0xff]  ;;  %v206_v35 = vld [vmem:[#allocation5 + $0x2f0] sm:$0xff]  ;;  %v156_v39 = vld [vmem:[#allocation5 + $0x160] sm:$0xff]  ;;  %v70_v41 = vperm.slane %v60_v33, 0  ;;  %v77_v52 = vperm.slane %v60_v33, 1 }
  0x18   :  { %248 = vmatpush.msra.mxu2 %v190_v18  ;;  %268 = vmatpush.msra.mxu3 %v191_v19  ;;  %v154_v37 = vld [vmem:[#allocation5 + $0x150] sm:$0xff]  ;;  %v155_v38 = vld [vmem:[#allocation5 + $0x158] sm:$0xff]  ;;  %v148_v43 = vld [vmem:[#allocation5 + $0x120] sm:$0xff] }
  0x19   :  { %229 = vmatpush.msra.mxu1 %v182_v20  ;;  %284 = vmatpush.msrb.mxu0 %v220_v28  ;;  %v199_v40 = vld [vmem:[#allocation5 + $0x2b8] sm:$0xff]  ;;  %v149_v44 = vld [vmem:[#allocation5 + $0x128] sm:$0xff]  ;;  %v192_v45 = vld [vmem:[#allocation5 + $0x280] sm:$0xff] }
  0x1a   :  { %249 = vmatpush.msra.mxu2 %v183_v21  ;;  %269 = vmatpush.msra.mxu3 %v184_v22  ;;  %v147_v42 = vld [vmem:[#allocation5 + $0x118] sm:$0xff]  ;;  %v140_v46 = vld [vmem:[#allocation5 + $0xe0] sm:$0xff]  ;;  %v141_v47 = vld [vmem:[#allocation5 + $0xe8] sm:$0xff] }
  0x1b   :  { %230 = vmatpush.msra.mxu1 %v175_v23  ;;  %285 = vmatpush.msrb.mxu0 %v213_v30  ;;  %v142_v48 = vld [vmem:[#allocation5 + $0xf0] sm:$0xff]  ;;  %v185_v49 = vld [vmem:[#allocation5 + $0x248] sm:$0xff]  ;;  %v135_v55 = vld [vmem:[#allocation5 + $0xb8] sm:$0xff] }
  0x1c   :  { %250 = vmatpush.msra.mxu2 %v176_v24  ;;  %270 = vmatpush.msra.mxu3 %v177_v25  ;;  %v452_v50 = vld [vmem:[%s623_s2] ss:$0 sm:$0xff]  ;;  %v133_v53 = vld [vmem:[#allocation5 + $0xa8] sm:$0xff]  ;;  %v127_v58 = vld [vmem:[#allocation5 + $0x78] sm:$0xff] }
  0x1d   :  { %231 = vmatpush.msra.mxu1 %v168_v26  ;;  %286 = vmatpush.msrb.mxu0 %v206_v35  ;;  %v134_v54 = vld [vmem:[#allocation5 + $0xb0] sm:$0xff]  ;;  %v128_v60 = vld [vmem:[#allocation5 + $0x80] sm:$0xff]  ;;  %v171_v61 = vld [vmem:[#allocation5 + $0x1d8] sm:$0xff] }
  0x1e   :  { %251 = vmatpush.msra.mxu2 %v169_v27  ;;  %271 = vmatpush.msra.mxu3 %v170_v29  ;;  %v178_v56 = vld [vmem:[#allocation5 + $0x210] sm:$0xff]  ;;  %v119_v0 = vld [vmem:[#allocation5 + $0x38] sm:$0xff]  ;;  %v120_v1 = vld [vmem:[#allocation5 + $0x40] sm:$0xff] }
  0x1f   :  { %232 = vmatpush.msra.mxu1 %v161_v31  ;;  %287 = vmatpush.msrb.mxu0 %v199_v40  ;;  %v126_v57 = vld [vmem:[#allocation5 + $0x70] sm:$0xff]  ;;  %v121_v2 = vld [vmem:[#allocation5 + $0x48] sm:$0xff]  ;;  %v164_v3 = vld [vmem:[#allocation5 + $0x1a0] sm:$0xff] }
  0x20   :  { %252 = vmatpush.msra.mxu2 %v162_v32  ;;  %272 = vmatpush.msra.mxu3 %v163_v34  ;;  %v112_v5 = vld [vmem:[#allocation5] sm:$0xff]  ;;  %v113_v6 = vld [vmem:[#allocation5 + $0x8] sm:$0xff]  ;;  %v114_v7 = vld [vmem:[#allocation5 + $0x10] sm:$0xff] }
  0x21   :  { %233 = vmatpush.msra.mxu1 %v154_v37  ;;  %288 = vmatpush.msrb.mxu0 %v192_v45  ;;  %v221_v9 = vld [vmem:[#allocation5 + $0x368] sm:$0xff]  ;;  %v222_v10 = vld [vmem:[#allocation5 + $0x370] sm:$0xff]  ;;  %v223_v11 = vld [vmem:[#allocation5 + $0x378] sm:$0xff] }
  0x22   :  { %253 = vmatpush.msra.mxu2 %v155_v38  ;;  %273 = vmatpush.msra.mxu3 %v156_v39  ;;  %v157_v12 = vld [vmem:[#allocation5 + $0x168] sm:$0xff]  ;;  %v214_v13 = vld [vmem:[#allocation5 + $0x330] sm:$0xff]  ;;  %v215_v14 = vld [vmem:[#allocation5 + $0x338] sm:$0xff] }
  0x23   :  { %234 = vmatpush.msra.mxu1 %v147_v42  ;;  %289 = vmatpush.msrb.mxu0 %v185_v49  ;;  %v216_v15 = vld [vmem:[#allocation5 + $0x340] sm:$0xff]  ;;  %v150_v16 = vld [vmem:[#allocation5 + $0x130] sm:$0xff]  ;;  %v207_v17 = vld [vmem:[#allocation5 + $0x2f8] sm:$0xff] }
  0x24   :  { %254 = vmatpush.msra.mxu2 %v148_v43  ;;  %274 = vmatpush.msra.mxu3 %v149_v44  ;;  %v208_v18 = vld [vmem:[#allocation5 + $0x300] sm:$0xff]  ;;  %v209_v19 = vld [vmem:[#allocation5 + $0x308] sm:$0xff]  ;;  %v143_v20 = vld [vmem:[#allocation5 + $0xf8] sm:$0xff] }
  0x25   :  { %235 = vmatpush.msra.mxu1 %v140_v46  ;;  %290 = vmatpush.msrb.mxu0 %v178_v56  ;;  %v200_v21 = vld [vmem:[#allocation5 + $0x2c0] sm:$0xff]  ;;  %v201_v22 = vld [vmem:[#allocation5 + $0x2c8] sm:$0xff]  ;;  %v202_v23 = vld [vmem:[#allocation5 + $0x2d0] sm:$0xff] }
  0x26   :  { %255 = vmatpush.msra.mxu2 %v141_v47  ;;  %275 = vmatpush.msra.mxu3 %v142_v48  ;;  %v136_v24 = vld [vmem:[#allocation5 + $0xc0] sm:$0xff]  ;;  %v193_v25 = vld [vmem:[#allocation5 + $0x288] sm:$0xff]  ;;  %v194_v26 = vld [vmem:[#allocation5 + $0x290] sm:$0xff] }
  0x27   :  { %236 = vmatpush.msra.mxu1 %v133_v53  ;;  %291 = vmatpush.msrb.mxu0 %v171_v61  ;;  %v195_v27 = vld [vmem:[#allocation5 + $0x298] sm:$0xff]  ;;  %v186_v28 = vld [vmem:[#allocation5 + $0x250] sm:$0xff]  ;;  %v188_v30 = vld [vmem:[#allocation5 + $0x260] sm:$0xff] }
  0x28   :  { %256 = vmatpush.msra.mxu2 %v134_v54  ;;  %276 = vmatpush.msra.mxu3 %v135_v55  ;;  %v187_v29 = vld [vmem:[#allocation5 + $0x258] sm:$0xff]  ;;  %v180_v32 = vld [vmem:[#allocation5 + $0x220] sm:$0xff]  ;;  %v181_v33 = vld [vmem:[#allocation5 + $0x228] sm:$0xff] }
  0x29   :  { %237 = vmatpush.msra.mxu1 %v126_v57  ;;  %292 = vmatpush.msrb.mxu0 %v164_v3  ;;  %v179_v31 = vld [vmem:[#allocation5 + $0x218] sm:$0xff]  ;;  %v172_v34 = vld [vmem:[#allocation5 + $0x1e0] sm:$0xff]  ;;  %v173_v35 = vld [vmem:[#allocation5 + $0x1e8] sm:$0xff] }
  0x2a   :  { %257 = vmatpush.msra.mxu2 %v127_v58  ;;  %277 = vmatpush.msra.mxu3 %v128_v60  ;;  %v165_v37 = vld [vmem:[#allocation5 + $0x1a8] sm:$0xff]  ;;  %v166_v38 = vld [vmem:[#allocation5 + $0x1b0] sm:$0xff]  ;;  %v167_v39 = vld [vmem:[#allocation5 + $0x1b8] sm:$0xff] }
  0x2b   :  { %238 = vmatpush.msra.mxu1 %v119_v0  ;;  %293 = vmatpush.msrb.mxu0 %v157_v12  ;;  %v129_v40 = vld [vmem:[#allocation5 + $0x88] sm:$0xff]  ;;  %v159_v42 = vld [vmem:[#allocation5 + $0x178] sm:$0xff]  ;;  %v160_v43 = vld [vmem:[#allocation5 + $0x180] sm:$0xff] }
  0x2c   :  { %258 = vmatpush.msra.mxu2 %v120_v1  ;;  %278 = vmatpush.msra.mxu3 %v121_v2  ;;  %v122_v44 = vld [vmem:[#allocation5 + $0x50] sm:$0xff]  ;;  %v151_v45 = vld [vmem:[#allocation5 + $0x138] sm:$0xff]  ;;  %v152_v46 = vld [vmem:[#allocation5 + $0x140] sm:$0xff] }
  0x2d   :  { %239 = vmatpush.msra.mxu1 %v112_v5  ;;  %294 = vmatpush.msrb.mxu0 %v150_v16  ;;  %v153_v47 = vld [vmem:[#allocation5 + $0x148] sm:$0xff]  ;;  %v115_v48 = vld [vmem:[#allocation5 + $0x18] sm:$0xff]  ;;  %v144_v49 = vld [vmem:[#allocation5 + $0x100] sm:$0xff] }
  0x2e   :  { %259 = vmatpush.msra.mxu2 %v113_v6  ;;  %279 = vmatpush.msra.mxu3 %v114_v7  ;;  %v138_v53 = vld [vmem:[#allocation5 + $0xd0] sm:$0xff]  ;;  %v139_v54 = vld [vmem:[#allocation5 + $0xd8] sm:$0xff]  ;;  %v132_v57 = vld [vmem:[#allocation5 + $0xa0] sm:$0xff] }
  0x2f   :  { %304 = vmatpush.msrb.mxu1 %v221_v9  ;;  %295 = vmatpush.msrb.mxu0 %v143_v20  ;;  %v130_v55 = vld [vmem:[#allocation5 + $0x90] sm:$0xff]  ;;  %v131_v56 = vld [vmem:[#allocation5 + $0x98] sm:$0xff]  ;;  %v125_v60 = vld [vmem:[#allocation5 + $0x68] sm:$0xff] }
  0x30   :  { %324 = vmatpush.msrb.mxu2 %v222_v10  ;;  %344 = vmatpush.msrb.mxu3 %v223_v11  ;;  %v123_v58 = vld [vmem:[#allocation5 + $0x58] sm:$0xff]  ;;  %v116_v61 = vld [vmem:[#allocation5 + $0x20] sm:$0xff]  ;;  %v453_v0 = vld [vmem:[%s625_s4] ss:$0 sm:$0xff]  ;;  %s554_s4 = smov [#allocation7]  }
  0x31   :  { %305 = vmatpush.msrb.mxu1 %v214_v13  ;;  %296 = vmatpush.msrb.mxu0 %v136_v24 }
  0x32   :  { %325 = vmatpush.msrb.mxu2 %v215_v14  ;;  %345 = vmatpush.msrb.mxu3 %v216_v15 }
  0x33   :  { %306 = vmatpush.msrb.mxu1 %v207_v17  ;;  %297 = vmatpush.msrb.mxu0 %v129_v40 }
  0x34   :  { %326 = vmatpush.msrb.mxu2 %v208_v18  ;;  %346 = vmatpush.msrb.mxu3 %v209_v19 }
  0x35   :  { %307 = vmatpush.msrb.mxu1 %v200_v21  ;;  %298 = vmatpush.msrb.mxu0 %v122_v44 }
  0x36   :  { %327 = vmatpush.msrb.mxu2 %v201_v22  ;;  %347 = vmatpush.msrb.mxu3 %v202_v23 }
  0x37   :  { %308 = vmatpush.msrb.mxu1 %v193_v25  ;;  %299 = vmatpush.msrb.mxu0 %v115_v48 }
  0x38   :  { %328 = vmatpush.msrb.mxu2 %v194_v26  ;;  %348 = vmatpush.msrb.mxu3 %v195_v27 }
  0x39   :  { %309 = vmatpush.msrb.mxu1 %v186_v28 }
  0x3a   :  { %329 = vmatpush.msrb.mxu2 %v187_v29  ;;  %349 = vmatpush.msrb.mxu3 %v188_v30 }
  0x3b   :  { %310 = vmatpush.msrb.mxu1 %v179_v31 }
  0x3c   :  { %330 = vmatpush.msrb.mxu2 %v180_v32  ;;  %350 = vmatpush.msrb.mxu3 %v181_v33 }
  0x3d   :  { %311 = vmatpush.msrb.mxu1 %v172_v34 }
  0x3e   :  { %331 = vmatpush.msrb.mxu2 %v173_v35 }
  0x3f   :  { %312 = vmatpush.msrb.mxu1 %v165_v37 }
  0x40   :  { %332 = vmatpush.msrb.mxu2 %v166_v38 }
  0x42   :  { %333 = vmatpush.msrb.mxu2 %v159_v42 }
  0x44   :  { %334 = vmatpush.msrb.mxu2 %v152_v46 }
  0x80   :  { %v68_v36 = vpop.permute.xlu0 %67 }
  0x81   :  { %v71_v51 = vmul.f32 %v70_v41, %v68_v36  ;;  %v174_v36 = vld [vmem:[#allocation5 + $0x1f0] sm:$0xff] }
  0x82   :  { %351 = vmatpush.msrb.mxu3 %v174_v36  ;;  %v158_v41 = vld [vmem:[#allocation5 + $0x170] sm:$0xff] }
  0x83   :  { %v72_v62 = vadd.f32 %v452_v50, %v71_v51  ;;  %313 = vmatpush.msrb.mxu1 %v158_v41  ;;  %v145_v50 = vld [vmem:[#allocation5 + $0x108] sm:$0xff]  ;;  %v146_v51 = vld [vmem:[#allocation5 + $0x110] sm:$0xff] }
  0x84   :  { %352 = vmatpush.msrb.mxu3 %v167_v39  ;;  %335 = vmatpush.msrb.mxu2 %v145_v50 }
  0x85   :  { %314 = vmatpush.msrb.mxu1 %v151_v45 }
  0x86   :  { %353 = vmatpush.msrb.mxu3 %v160_v43  ;;  %336 = vmatpush.msrb.mxu2 %v138_v53 }
  0x87   :  { %315 = vmatpush.msrb.mxu1 %v144_v49 }
  0x88   :  { %354 = vmatpush.msrb.mxu3 %v153_v47  ;;  %337 = vmatpush.msrb.mxu2 %v131_v56 }
  0x89   :  { %v75_v59 = vpop.permute.xlu0 %74 }
  0x8a   :  { %v78_v63 = vmul.f32 %v77_v52, %v75_v59  ;;  %355 = vmatpush.msrb.mxu3 %v146_v51  ;;  %v137_v52 = vld [vmem:[#allocation5 + $0xc8] sm:$0xff]  ;;  %v124_v59 = vld [vmem:[#allocation5 + $0x60] sm:$0xff] }
  0x8b   :  { %316 = vmatpush.msrb.mxu1 %v137_v52  ;;  %338 = vmatpush.msrb.mxu2 %v124_v59 }
  0x8c   :  { %v79_v4 = vadd.f32 %v78_v63, %v72_v62  ;;  %356 = vmatpush.msrb.mxu3 %v139_v54  ;;  %v117_v62 = vld [vmem:[#allocation5 + $0x28] sm:$0xff]  ;;  %v118_v63 = vld [vmem:[#allocation5 + $0x30] sm:$0xff] }
  0x8d   :  { %317 = vmatpush.msrb.mxu1 %v130_v55  ;;  %339 = vmatpush.msrb.mxu2 %v117_v62 }
  0x8e   :  { %v80_v8 = vmax.f32 %v79_v4, 0.0  ;;  %357 = vmatpush.msrb.mxu3 %v132_v57  ;;  %v364_v4 = vld [vmem:[%s627_s6] sm:$0x7f]  ;;  %s427_s6 = sshll.u32 %s554_s4, 4  ;;  %s428_s6 = int_to_ptr.vmem [resolvable:$true] %s427_s6 }
  0x8f   :  { %318 = vmatpush.msrb.mxu1 %v123_v58  ;;  %v366_v5 = vperm.slane %v364_v4, 0  ;;  %v369_v6 = vperm.slane %v364_v4, 3  ;;  %v367_v12 = vperm.slane %v364_v4, 1  ;;  %v368_v14 = vperm.slane %v364_v4, 2 }
  0x90   :  { %440 = vmatmul.msk.f32.vlgmr.msra.gmra.mxu0 %vm87_vm0, %v80_v8  ;;  %358 = vmatpush.msrb.mxu3 %v125_v60  ;;  %v370_v15 = vperm.slane %v364_v4, 4  ;;  %v371_v26 = vperm.slane %v364_v4, 5  ;;  %v372_v29 = vperm.slane %v364_v4, 6 }
  0x91   :  { %319 = vmatpush.msrb.mxu1 %v116_v61 }
  0x92   :  { %359 = vmatpush.msrb.mxu3 %v118_v63 }
 0x10d   :  { %v108_v1 = vpop.f32.mrf.mxu0 }
 0x10e   :  { %v109_v2 = vadd.f32 %v453_v0, %v108_v1 }
 0x110   :  { %v111_v3 = vmax.f32 %v109_v2, 0.0 }
 0x112   :  { %240 = vmatmul.f32.vlgmr.msra.gmra.mxu1 %v111_v3  ;;  %260 = vmatmul.f32.vlgmr.msra.gmra.mxu2 %v111_v3 }
 0x113   :  { %280 = vmatmul.f32.vlgmr.msra.gmra.mxu3 %v111_v3  ;;  %300 = vmatmul.f32.vlgmr.msrb.gmra.mxu0 %v111_v3 }
 0x11a   :  { %320 = vmatmul.f32.vlgmr.msrb.gmra.mxu1 %v111_v3  ;;  %340 = vmatmul.f32.vlgmr.msrb.gmra.mxu2 %v111_v3 }
 0x11b   :  { %360 = vmatmul.f32.vlgmr.msrb.gmra.mxu3 %v111_v3 }
 0x18f   :  { %v241_v7 = vpop.f32.mrf.mxu1 }
 0x190   :  { %v380_v8 = vadd.f32 %v366_v5, %v241_v7  ;;  %v301_v9 = vpop.f32.mrf.mxu0 }
 0x191   :  { %v383_v10 = vadd.f32 %v369_v6, %v301_v9 }
 0x192   :  { %v387_v11 = vmul.f32 0.5, %v380_v8 }
 0x193   :  { %v390_v13 = vmul.f32 0.5, %v383_v10 }
 0x194   :  { %454 = vtanh.f32 %v387_v11 }
 0x195   :  { %456 = vtanh.f32 %v390_v13  ;;  %v261_v16 = vpop.f32.mrf.mxu2 }
 0x196   :  { %v381_v17 = vadd.f32 %v367_v12, %v261_v16  ;;  %v281_v18 = vpop.f32.mrf.mxu3 }
 0x197   :  { %v382_v19 = vadd.f32 %v368_v14, %v281_v18  ;;  %v321_v20 = vpop.f32.mrf.mxu1 }
 0x198   :  { %v388_v21 = vmul.f32 0.5, %v381_v17  ;;  %v384_v22 = vadd.f32 %v370_v15, %v321_v20 }
 0x199   :  { %v389_v23 = vmul.f32 0.5, %v382_v19 }
 0x19a   :  { %v455_v24 = vpop.eup %454  ;;  %458 = vtanh.f32 %v388_v21  ;;  %v391_v25 = vmul.f32 0.5, %v384_v22 }
 0x19b   :  { %v457_v27 = vpop.eup %456  ;;  %v401_v28 = vmul.f32 0.5, %v455_v24  ;;  %460 = vtanh.f32 %v389_v23 }
 0x19c   :  { %v404_v30 = vmul.f32 0.5, %v457_v27  ;;  %462 = vtanh.f32 %v391_v25 }
 0x19d   :  { %v408_v31 = vadd.f32 0.5, %v401_v28  ;;  %v341_v32 = vpop.f32.mrf.mxu2 }
 0x19e   :  { %v411_v33 = vadd.f32 0.5, %v404_v30  ;;  %v385_v34 = vadd.f32 %v371_v26, %v341_v32  ;;  %v361_v35 = vpop.f32.mrf.mxu3 }
 0x19f   :  { %415 = vst [vmem:[#allocation7] sm:$0xff] %v408_v31  ;;  %v386_v36 = vadd.f32 %v372_v29, %v361_v35 }
 0x1a0   :  { %v459_v37 = vpop.eup %458  ;;  %418 = vst [vmem:[#allocation7 + $0x18] sm:$0xff] %v411_v33  ;;  %v392_v38 = vmul.f32 0.5, %v385_v34 }
 0x1a1   :  { %v461_v39 = vpop.eup %460  ;;  %v402_v40 = vmul.f32 0.5, %v459_v37  ;;  %v393_v41 = vmul.f32 0.5, %v386_v36 }
 0x1a2   :  { %v463_v42 = vpop.eup %462  ;;  %v403_v43 = vmul.f32 0.5, %v461_v39  ;;  %464 = vtanh.f32 %v392_v38 }
 0x1a3   :  { %v409_v44 = vadd.f32 0.5, %v402_v40  ;;  %v405_v45 = vmul.f32 0.5, %v463_v42  ;;  %466 = vtanh.f32 %v393_v41 }
 0x1a4   :  { %v410_v46 = vadd.f32 0.5, %v403_v43 }
 0x1a5   :  { %416 = vst [vmem:[#allocation7 + $0x8] sm:$0xff] %v409_v44  ;;  %v412_v47 = vadd.f32 0.5, %v405_v45 }
 0x1a6   :  { %417 = vst [vmem:[#allocation7 + $0x10] sm:$0xff] %v410_v46 }
 0x1a7   :  { %419 = vst [vmem:[#allocation7 + $0x20] sm:$0xff] %v412_v47 }
 0x1a8   :  { %v465_v48 = vpop.eup %464 }
 0x1a9   :  { %v467_v49 = vpop.eup %466  ;;  %v406_v50 = vmul.f32 0.5, %v465_v48 }
 0x1aa   :  { %v407_v51 = vmul.f32 0.5, %v467_v49 }
 0x1ab   :  { %v413_v52 = vadd.f32 0.5, %v406_v50 }
 0x1ac   :  { %v414_v53 = vadd.f32 0.5, %v407_v51 }
 0x1ad   :  { %420 = vst [vmem:[#allocation7 + $0x28] sm:$0xff] %v413_v52 }
 0x1ae   :  { %421 = vst.msk [vmem:[#allocation7 + $0x30] sm:$0xff] %vm87_vm0, %v414_v53 }
 0x1af   :  { %432 = dma.vmem_to_hbm [thread:$0]  %s428_s6, 896, %s430_s22, [#allocation4]  }
 0x1b0   :  { %544 = dma.done.wait [#allocation4], 896  }
 0x1b1   :  { %545 = vsyncadd [#allocation4], 4294966400 }
 0x1b2   :  { %437 = vsyncpa [#allocation3], 1 }
 0x1b3   :  { %438 = vsyncpa [#allocation6], 1 }
 0x1b4   :  { %439 = vsyncpa [#allocation4], 1 }

</bundles_post_ra>
